<compile_context>
chip_gen: v7x
topology: tpu7x:2x2x1
jax: 0.10.0
libtpu: 0.0.40
codegen_flags: <defaults>
</compile_context>

<pallas_src>
import jax
import jax.numpy as jnp
import numpy as np
from jax.experimental import pallas as pl
from jax.experimental.pallas import tpu as pltpu


def _drop_path_kernel(x_ref, s_ref, o_ref):
    # (TB, TF) * (TB, 1) row-broadcast multiply; single fused multiply, no
    # per-element dtype churn (scale is already in x's dtype).
    o_ref[...] = x_ref[...] * s_ref[...]


def _choose_tiles(B, F, itemsize):
    """Pick (TB, TF): sublane-aligned rows, lane-dense columns, ~2 MiB blocks."""
    lane = 128
    sublane = max(8, 32 // itemsize)      # 8 for f32, 16 for bf16, 32 for int8
    target_bytes = 2 * 1024 * 1024        # per block; 2x(in+out) buffers << scoped VMEM

    TB = B if B <= sublane else sublane   # == full dim, or a sublane multiple

    if F % lane == 0:
        tf = (target_bytes // max(1, TB * itemsize)) // lane * lane
        TF = int(min(F, max(lane, tf)))   # multiple of 128
    else:
        # F not lane-aligned: keep the whole feature dim resident (block dim
        # equal to the full array dim is always legal).
        TF = F

    # If one feature tile already covers F, grow TB (sublane-aligned) so the
    # block still amortizes per-step overhead for large batches of small F.
    if TF == F and B > sublane:
        rows = max(1, target_bytes // max(1, TF * itemsize))
        TB = int(min(B, max(sublane, (rows // sublane) * sublane)))

    return TB, TF


def drop_path(x, *, drop_prob: float = 0.0, training: bool = False,
              scale_by_keep: bool = True, key=None, seed: int = 0):
    """Pallas implementation of torch's drop_path() forward."""
    if drop_prob == 0.0 or not training:
        return x
    keep_prob = 1.0 - drop_prob

    B = int(x.shape[0])
    F = int(np.prod(x.shape[1:])) if x.ndim > 1 else 1
    x2 = x.reshape(B, F)
    itemsize = jnp.dtype(x.dtype).itemsize

    # Per-sample keep/scale vector, drawn once (single stream -> no per-sample
    # seed-correlation concerns), in x's dtype (matches torch semantics).
    if key is None:
        key = jax.random.PRNGKey(seed)
    keep = jax.random.bernoulli(key, p=keep_prob, shape=(B,))
    scale_val = (1.0 / keep_prob) if (scale_by_keep and keep_prob > 0.0) else 1.0
    scale = jnp.where(keep,
                      jnp.asarray(scale_val, dtype=x.dtype),
                      jnp.asarray(0.0, dtype=x.dtype)).reshape(B, 1)

    TB, TF = _choose_tiles(B, F, itemsize)
    grid = (pl.cdiv(B, TB), pl.cdiv(F, TF))

    out = pl.pallas_call(
        _drop_path_kernel,
        out_shape=jax.ShapeDtypeStruct((B, F), x.dtype),
        grid=grid,
        in_specs=[
            pl.BlockSpec((TB, TF), lambda i, j: (i, j)),   # x tile
            pl.BlockSpec((TB, 1), lambda i, j: (i, 0)),    # per-row scale
        ],
        out_specs=pl.BlockSpec((TB, TF), lambda i, j: (i, j)),
        compiler_params=pltpu.CompilerParams(
            dimension_semantics=("parallel", "parallel")),
    )(x2, scale)
    return out.reshape(x.shape)


class DropPath:
    """Mirror of the PyTorch DropPath module (no parameters)."""

    def __init__(self, drop_prob: float = 0.0, scale_by_keep: bool = True):
        self.drop_prob = float(drop_prob)
        self.scale_by_keep = scale_by_keep

    def __call__(self, x, *, training: bool = True, key=None, seed: int = 0):
        return drop_path(x, drop_prob=self.drop_prob, training=training,
                         scale_by_keep=self.scale_by_keep, key=key, seed=seed)


if __name__ == "__main__":
    key = jax.random.PRNGKey(0)
    # batch=2, seq=8, hidden=32 (DropPath works on any (B, ...) tensor)
    B, N, D = 2, 8, 32
    x = jax.random.normal(key, (B, N, D), dtype=jnp.float32)

    module = DropPath(drop_prob=0.25, scale_by_keep=True)

    # Training mode: per-sample drop / scale.
    y = module(x, training=True, seed=42)
    jax.block_until_ready(y)

    keep_prob = 1.0 - module.drop_prob
    xn, yn = np.asarray(x), np.asarray(y)
    for b in range(B):
        dropped = np.allclose(yn[b], 0.0)
        kept = np.allclose(yn[b], xn[b] / keep_prob, rtol=1e-5, atol=1e-5)
        assert dropped or kept, "sample is neither dropped nor kept+scaled"

    # Determinism: same seed -> same mask.
    y2 = module(x, training=True, seed=42)
    jax.block_until_ready(y2)
    assert np.allclose(np.asarray(y2), yn)

    # Eval mode / drop_prob == 0: identity.
    y_eval = module(x, training=False)
    jax.block_until_ready(y_eval)
    assert np.allclose(np.asarray(y_eval), xn)

    print("KERNEL_OK")
</pallas_src>

<mosaic_0001>
module attributes {stable_mosaic.version = 11 : i64} {
  func.func @_drop_path_kernel(%arg0: i32, %arg1: i32, %arg2: memref<2x256xf32, #tpu.memory_space<vmem>>, %arg3: memref<2x1xf32, #tpu.memory_space<vmem>>, %arg4: memref<2x256xf32, #tpu.memory_space<vmem>>) attributes {dimension_semantics = [#tpu.dimension_semantics<parallel>, #tpu.dimension_semantics<parallel>], iteration_bounds = array<i64: 1, 1>, scalar_prefetch = 0 : i64, scratch_operands = 0 : i64, tpu.core_type = #tpu.core_type<tc>, window_params = [{transform_indices = @transform_0, window_bounds = array<i64: 2, 256>}, {transform_indices = @transform_1, window_bounds = array<i64: 2, 1>}, {transform_indices = @transform_2, window_bounds = array<i64: 2, 256>}]} {
    %c0 = arith.constant 0 : index
    %c0_0 = arith.constant 0 : index
    %0 = vector.load %arg2[%c0, %c0_0] : memref<2x256xf32, #tpu.memory_space<vmem>>, vector<2x256xf32>
    %c0_1 = arith.constant 0 : index
    %c0_2 = arith.constant 0 : index
    %1 = vector.load %arg3[%c0_1, %c0_2] : memref<2x1xf32, #tpu.memory_space<vmem>>, vector<2x1xf32>
    %2 = vector.broadcast %1 : vector<2x1xf32> to vector<2x256xf32>
    %3 = arith.mulf %0, %2 : vector<2x256xf32>
    %c0_3 = arith.constant 0 : index
    %c0_4 = arith.constant 0 : index
    %4 = vector.load %arg4[%c0_3, %c0_4] : memref<2x256xf32, #tpu.memory_space<vmem>>, vector<2x256xf32>
    tpu.vector_store %arg4[%c0_3, %c0_4], %3 {strides = array<i32>} : memref<2x256xf32, #tpu.memory_space<vmem>>, vector<2x256xf32>,
    return
  }
  func.func @transform_0(%arg0: i32, %arg1: i32) -> (i32, i32) {
    %c0_i32 = arith.constant 0 : i32
    return %arg0, %arg1 : i32, i32
  }
  func.func @transform_1(%arg0: i32, %arg1: i32) -> (i32, i32) {
    %c0_i32 = arith.constant 0 : i32
    %c0_i32_0 = arith.constant 0 : i32
    return %arg0, %c0_i32 : i32, i32
  }
  func.func @transform_2(%arg0: i32, %arg1: i32) -> (i32, i32) {
    %c0_i32 = arith.constant 0 : i32
    return %arg0, %arg1 : i32, i32
  }
}

</mosaic_0001>

<bundles_post_ra>
// kernel: tpu_custom_call.1
= control target key start
LH: loop header
LB: loop body
LE: loop exit
PB: predicated region body
PF: predicated region fallthrough
CT: control target
= control target key end

     0   :  { %7 = vsyncpa [#allocation3], 0  ;;  %s154_s0 = inlined_call_operand.hbm [shape: f32[2,256], index: 0, kind: input, shape index: {}]   ;;  %s155_s1 = inlined_call_operand.vmem [shape: f32[2,1], index: 1, kind: input, shape index: {}]   ;;  %s156_s2 = inlined_call_operand.hbm [shape: f32[2,256], index: 2, kind: output, shape index: {}]  }
   0x1   :  { %8 = vsyncpa [#allocation4], 0  ;;  %s108_s9 = smov [#allocation2]   ;;  %s60_s13 = scalar_lea.hbm %s154_s0, 64 }
   0x2   :  { %s15_s10 = sshll.u32 %s108_s9, 4  ;;  %p61_p0 = scmp.ne.s32.totalorder %s154_s0, %s60_s13  ;;  %s16_s10 = int_to_ptr.vmem [resolvable:$true] %s15_s10 }
   0x3   :  { %p64_p1 = scmp.lt.u32.totalorder %s60_s13, %s154_s0 }
   0x5   :  { %p66_p2 = pnand %p64_p1, %p61_p0 }
   0x7   :  { %69 = shalt.err (!%p66_p2)
}
   0x8   :  { %s70_s18 = scalar_lea.vmem %s16_s10, 64  ;;  %p75_p4 = scmp.lt.s32.totalorder %s16_s10, %s16_s10 }
   0x9   :  { %p71_p3 = scmp.ne.s32.totalorder %s16_s10, %s70_s18  ;;  %p76_p5 = scmp.lt.s32.totalorder %s70_s18, %s70_s18 }
   0xb   :  { %p77_p6 = por %p76_p5, %p75_p4 }
   0xd   :  { %p78_p7 = pnand %p77_p6, %p71_p3 }
   0xf   :  { %81 = shalt.err (!%p78_p7)
}
  0x10   :  { %18 = dma.hbm_to_vmem [thread:$0]  %s154_s0, 64, %s16_s10, [#allocation3]  }
  0x11   :  { %104 = dma.done.wait [#allocation3], 64  }
  0x12   :  { %105 = vsyncadd [#allocation3], 4294967232  ;;  %v109_v0 = vmov 0   ;;  %v25_v1 = vld [vmem:[%s155_s1] sm:$0x3]  ;;  %v33_v4 = vlaneseq  ;;  %s111_s23 = smov [#allocation5]  }
  0x13   :  { %59 = vset.pattern.permute.xlu0 %v109_v0  ;;  %v110_v2 = vmov 269488144   ;;  %v24_v9 = vld [vmem:[#allocation2] sm:$0xf]  ;;  %s46_s24 = sshll.u32 %s111_s23, 4  ;;  %s47_s24 = int_to_ptr.vmem [resolvable:$true] %s46_s24 }
  0x14   :  { %28 = vperm.xlu0 %59, %v25_v1   ;;  %v31_v3 = vunpack.c.l.s4 %v110_v2  ;;  %v34_v6 = vshrl.u32 %v33_v4, 7  ;;  %s82_s0 = scalar_lea.vmem %s47_s24, 64  ;;  %p87_p9 = scmp.lt.s32.totalorder %s47_s24, %s47_s24 }
  0x15   :  { %p83_p8 = scmp.ne.s32.totalorder %s47_s24, %s82_s0  ;;  %p88_p10 = scmp.lt.s32.totalorder %s82_s0, %s82_s0 }
  0x16   :  { %v32_v5 = vunpack.c.0.s8 %v31_v3 }
  0x17   :  { %p89_p11 = por %p88_p10, %p87_p9 }
  0x18   :  { %v35_v7 = vsub.s32 %v32_v5, %v34_v6 }
  0x19   :  { %p90_p12 = pnand %p89_p11, %p83_p8 }
  0x93   :  { %v29_v8 = vpop.permute.xlu0 %28 }
  0x94   :  { %v36_v10 = vrot.slane %v29_v8, %v35_v7 }
  0x96   :  { %v38_v11 = vmul.f32 %v36_v10, %v24_v9 }
  0x98   :  { %39 = vst [vmem:[#allocation5] sm:$0xf] %v38_v11 }
  0x99   :  { %93 = shalt.err (!%p90_p12)
}
  0x9a   :  { %s94_s26 = scalar_lea.hbm %s156_s2, 64 }
  0x9b   :  { %p95_p13 = scmp.ne.s32.totalorder %s156_s2, %s94_s26  ;;  %p98_p0 = scmp.lt.u32.totalorder %s94_s26, %s156_s2 }
  0x9d   :  { %p100_p1 = pnand %p98_p0, %p95_p13 }
  0x9f   :  { %103 = shalt.err (!%p100_p1)
}
  0xa0   :  { %49 = dma.vmem_to_hbm [thread:$0]  %s47_s24, 64, %s156_s2, [#allocation4]  }
  0xa1   :  { %106 = dma.done.wait [#allocation4], 64  }
  0xa2   :  { %107 = vsyncadd [#allocation4], 4294967232 }
  0xa3   :  { %53 = vsyncpa [#allocation3], 1 }
  0xa4   :  { %54 = vsyncpa [#allocation4], 1 }

</bundles_post_ra>
